<compile_context>
chip_gen: v7x
topology: tpu7x:2x2x1
jax: 0.10.0
libtpu: 0.0.40
codegen_flags: <defaults>
</compile_context>

<pallas_src>
import functools

import jax
import jax.numpy as jnp
from jax.experimental import pallas as pl
from jax.experimental.pallas import tpu as pltpu


def _vae_kernel(
    x_ref, eps_ref,
    w1_ref, b1_ref, w2_ref, b2_ref,          # encoder (weights bf16, biases f32)
    whead_ref, bhead_ref,                    # fused mu|log_var head
    wd1_ref, bd1_ref, wd2_ref, bd2_ref, wd3_ref, bd3_ref,  # decoder
    out_ref,                                 # (TB, input_dim + 2*latent) slab
    *, latent_dim,
):
    bf16 = jnp.bfloat16
    f32 = jnp.float32

    def dot(act_f32, w_ref):
        # bf16 MXU matmul, f32 accumulation.
        return jnp.dot(act_f32.astype(bf16), w_ref[...],
                       preferred_element_type=f32)

    x = x_ref[...]  # f32

    # Encoder: Linear -> ReLU -> Linear -> ReLU
    h = jnp.maximum(dot(x, w1_ref) + b1_ref[...], 0.0)
    h = jnp.maximum(dot(h, w2_ref) + b2_ref[...], 0.0)

    # Fused latent heads: one matmul produces [mu | log_var].
    head = dot(h, whead_ref) + bhead_ref[...]
    mu = head[:, :latent_dim]
    log_var = head[:, latent_dim:]

    # Reparameterization trick (f32): z = mu + eps * exp(0.5 * log_var)
    std = jnp.exp(0.5 * log_var)
    z = mu + eps_ref[...] * std

    # Decoder: Linear -> ReLU -> Linear -> ReLU -> Linear
    d = jnp.maximum(dot(z, wd1_ref) + bd1_ref[...], 0.0)
    d = jnp.maximum(dot(d, wd2_ref) + bd2_ref[...], 0.0)
    x_recon = dot(d, wd3_ref) + bd3_ref[...]

    # Single lane-denser store: [x_recon | mu | log_var]
    out_ref[...] = jnp.concatenate([x_recon, mu, log_var], axis=-1)


def vae_forward(x, eps, params, *, block_batch=128):
    """Runs the VAE forward in one Pallas call, gridded over the batch axis."""
    batch, input_dim = x.shape
    latent_dim = eps.shape[1]
    out_width = input_dim + 2 * latent_dim

    # Batch tile: multiple of 8 sublanes, capped by block_batch.
    tb = min(block_batch, pl.cdiv(batch, 8) * 8)
    padded_batch = pl.cdiv(batch, tb) * tb
    if padded_batch != batch:
        pad = padded_batch - batch
        x = jnp.pad(x, ((0, pad), (0, 0)))
        eps = jnp.pad(eps, ((0, pad), (0, 0)))
    grid = (padded_batch // tb,)

    bf16 = jnp.bfloat16
    # Fuse the two latent heads; pre-cast weights to bf16 (biases stay f32).
    whead = jnp.concatenate([params["wmu"], params["wvar"]], axis=1)
    bhead = jnp.concatenate([params["bmu"], params["bvar"]], axis=1)
    weights = dict(
        w1=params["w1"].astype(bf16), b1=params["b1"],
        w2=params["w2"].astype(bf16), b2=params["b2"],
        whead=whead.astype(bf16), bhead=bhead,
        wd1=params["wd1"].astype(bf16), bd1=params["bd1"],
        wd2=params["wd2"].astype(bf16), bd2=params["bd2"],
        wd3=params["wd3"].astype(bf16), bd3=params["bd3"],
    )

    def const_spec(arr):
        # Weight / bias: full-array block, same block index every grid step
        # (kept resident in VMEM, DMA'd only once).
        return pl.BlockSpec(arr.shape, lambda i: (0,) * arr.ndim)

    operands = (
        x, eps,
        weights["w1"], weights["b1"], weights["w2"], weights["b2"],
        weights["whead"], weights["bhead"],
        weights["wd1"], weights["bd1"], weights["wd2"], weights["bd2"],
        weights["wd3"], weights["bd3"],
    )

    in_specs = [
        pl.BlockSpec((tb, input_dim), lambda i: (i, 0)),    # x (pipelined)
        pl.BlockSpec((tb, latent_dim), lambda i: (i, 0)),   # eps (pipelined)
    ] + [const_spec(w) for w in operands[2:]]

    out = pl.pallas_call(
        functools.partial(_vae_kernel, latent_dim=latent_dim),
        out_shape=jax.ShapeDtypeStruct((padded_batch, out_width), jnp.float32),
        grid=grid,
        in_specs=in_specs,
        out_specs=pl.BlockSpec((tb, out_width), lambda i: (i, 0)),
        compiler_params=pltpu.CompilerParams(
            dimension_semantics=("parallel",),      # megacore split on v7x
            vmem_limit_bytes=32 * 1024 * 1024,      # fits v7x scoped VMEM
        ),
    )(*operands)

    out = out[:batch]
    x_recon = out[:, :input_dim]
    mu = out[:, input_dim:input_dim + latent_dim]
    log_var = out[:, input_dim + latent_dim:]
    return x_recon, mu, log_var


def init_params(key, input_dim, hidden_dim, latent_dim):
    """Deterministic synthetic parameters (weights (in, out), biases (1, out))."""
    def linear(k, fan_in, fan_out):
        kw, kb = jax.random.split(k)
        bound = 1.0 / jnp.sqrt(fan_in)
        w = jax.random.uniform(kw, (fan_in, fan_out), jnp.float32, -bound, bound)
        b = jax.random.uniform(kb, (1, fan_out), jnp.float32, -bound, bound)
        return w, b

    keys = jax.random.split(key, 8)
    p = {}
    p["w1"], p["b1"] = linear(keys[0], input_dim, hidden_dim)
    p["w2"], p["b2"] = linear(keys[1], hidden_dim, hidden_dim)
    p["wmu"], p["bmu"] = linear(keys[2], hidden_dim, latent_dim)
    p["wvar"], p["bvar"] = linear(keys[3], hidden_dim, latent_dim)
    p["wd1"], p["bd1"] = linear(keys[4], latent_dim, hidden_dim)
    p["wd2"], p["bd2"] = linear(keys[5], hidden_dim, hidden_dim)
    p["wd3"], p["bd3"] = linear(keys[6], hidden_dim, input_dim)
    return p


def vae_forward_ref_bf16(x, eps, p):
    """Pure-JAX reference mirroring the kernel's bf16-matmul / f32-accumulate."""
    bf16 = jnp.bfloat16

    def dot(a, w):
        return jnp.dot(a.astype(bf16), w.astype(bf16),
                       preferred_element_type=jnp.float32)

    h = jnp.maximum(dot(x, p["w1"]) + p["b1"], 0.0)
    h = jnp.maximum(dot(h, p["w2"]) + p["b2"], 0.0)
    mu = dot(h, p["wmu"]) + p["bmu"]
    log_var = dot(h, p["wvar"]) + p["bvar"]
    z = mu + eps * jnp.exp(0.5 * log_var)
    d = jnp.maximum(dot(z, p["wd1"]) + p["bd1"], 0.0)
    d = jnp.maximum(dot(d, p["wd2"]) + p["bd2"], 0.0)
    x_recon = dot(d, p["wd3"]) + p["bd3"]
    return x_recon, mu, log_var


def vae_forward_ref_f32(x, eps, p):
    """Full-f32 reference (PyTorch semantics) for a loose sanity check."""
    h = jnp.maximum(x @ p["w1"] + p["b1"], 0.0)
    h = jnp.maximum(h @ p["w2"] + p["b2"], 0.0)
    mu = h @ p["wmu"] + p["bmu"]
    log_var = h @ p["wvar"] + p["bvar"]
    z = mu + eps * jnp.exp(0.5 * log_var)
    d = jnp.maximum(z @ p["wd1"] + p["bd1"], 0.0)
    d = jnp.maximum(d @ p["wd2"] + p["bd2"], 0.0)
    x_recon = d @ p["wd3"] + p["bd3"]
    return x_recon, mu, log_var


if __name__ == "__main__":
    # Small tabular-VAE shapes consistent with the module; batch chosen so the
    # grid has >1 step (block_batch=32 -> grid=(2,)).
    batch, input_dim, hidden_dim, latent_dim = 64, 16, 32, 8

    key = jax.random.PRNGKey(0)
    k_x, k_eps, k_p = jax.random.split(key, 3)

    x = jax.random.normal(k_x, (batch, input_dim), jnp.float32)
    eps = jax.random.normal(k_eps, (batch, latent_dim), jnp.float32)
    params = init_params(k_p, input_dim, hidden_dim, latent_dim)

    x_recon, mu, log_var = jax.block_until_ready(
        vae_forward(x, eps, params, block_batch=32))

    # Check against a reference with matching bf16 matmul precision.
    xr_b, mu_b, lv_b = vae_forward_ref_bf16(x, eps, params)
    assert jnp.allclose(x_recon, xr_b, atol=1e-2, rtol=1e-2), "x_recon mismatch (bf16 ref)"
    assert jnp.allclose(mu, mu_b, atol=1e-2, rtol=1e-2), "mu mismatch (bf16 ref)"
    assert jnp.allclose(log_var, lv_b, atol=1e-2, rtol=1e-2), "log_var mismatch (bf16 ref)"

    # Loose sanity check against the full-f32 (PyTorch-semantics) reference.
    xr_f, mu_f, lv_f = vae_forward_ref_f32(x, eps, params)
    assert jnp.allclose(x_recon, xr_f, atol=0.15, rtol=0.05), "x_recon far from f32 ref"
    assert jnp.allclose(mu, mu_f, atol=0.15, rtol=0.05), "mu far from f32 ref"
    assert jnp.allclose(log_var, lv_f, atol=0.15, rtol=0.05), "log_var far from f32 ref"

    print("KERNEL_OK")
</pallas_src>

<mosaic_0001>
module attributes {stable_mosaic.version = 11 : i64} {
  func.func @_vae_kernel(%arg0: i32, %arg1: memref<32x16xf32, #tpu.memory_space<vmem>>, %arg2: memref<32x8xf32, #tpu.memory_space<vmem>>, %arg3: memref<16x32xbf16, #tpu.memory_space<vmem>>, %arg4: memref<1x32xf32, #tpu.memory_space<vmem>>, %arg5: memref<32x32xbf16, #tpu.memory_space<vmem>>, %arg6: memref<1x32xf32, #tpu.memory_space<vmem>>, %arg7: memref<32x16xbf16, #tpu.memory_space<vmem>>, %arg8: memref<1x16xf32, #tpu.memory_space<vmem>>, %arg9: memref<8x32xbf16, #tpu.memory_space<vmem>>, %arg10: memref<1x32xf32, #tpu.memory_space<vmem>>, %arg11: memref<32x32xbf16, #tpu.memory_space<vmem>>, %arg12: memref<1x32xf32, #tpu.memory_space<vmem>>, %arg13: memref<32x16xbf16, #tpu.memory_space<vmem>>, %arg14: memref<1x16xf32, #tpu.memory_space<vmem>>, %arg15: memref<32x32xf32, #tpu.memory_space<vmem>>) attributes {dimension_semantics = [#tpu.dimension_semantics<parallel>], iteration_bounds = array<i64: 2>, scalar_prefetch = 0 : i64, scratch_operands = 0 : i64, tpu.core_type = #tpu.core_type<tc>, window_params = [{transform_indices = @transform_0, window_bounds = array<i64: 32, 16>}, {transform_indices = @transform_1, window_bounds = array<i64: 32, 8>}, {pipeline_mode = #tpu.pipeline_mode<synchronous>, transform_indices = @transform_2, window_bounds = array<i64: 16, 32>}, {pipeline_mode = #tpu.pipeline_mode<synchronous>, transform_indices = @transform_3, window_bounds = array<i64: 1, 32>}, {pipeline_mode = #tpu.pipeline_mode<synchronous>, transform_indices = @transform_4, window_bounds = array<i64: 32, 32>}, {pipeline_mode = #tpu.pipeline_mode<synchronous>, transform_indices = @transform_5, window_bounds = array<i64: 1, 32>}, {pipeline_mode = #tpu.pipeline_mode<synchronous>, transform_indices = @transform_6, window_bounds = array<i64: 32, 16>}, {pipeline_mode = #tpu.pipeline_mode<synchronous>, transform_indices = @transform_7, window_bounds = array<i64: 1, 16>}, {pipeline_mode = #tpu.pipeline_mode<synchronous>, transform_indices = @transform_8, window_bounds = array<i64: 8, 32>}, {pipeline_mode = #tpu.pipeline_mode<synchronous>, transform_indices = @transform_9, window_bounds = array<i64: 1, 32>}, {pipeline_mode = #tpu.pipeline_mode<synchronous>, transform_indices = @transform_10, window_bounds = array<i64: 32, 32>}, {pipeline_mode = #tpu.pipeline_mode<synchronous>, transform_indices = @transform_11, window_bounds = array<i64: 1, 32>}, {pipeline_mode = #tpu.pipeline_mode<synchronous>, transform_indices = @transform_12, window_bounds = array<i64: 32, 16>}, {pipeline_mode = #tpu.pipeline_mode<synchronous>, transform_indices = @transform_13, window_bounds = array<i64: 1, 16>}, {transform_indices = @transform_14, window_bounds = array<i64: 32, 32>}]} {
    %c0 = arith.constant 0 : index
    %c0_0 = arith.constant 0 : index
    %0 = vector.load %arg1[%c0, %c0_0] : memref<32x16xf32, #tpu.memory_space<vmem>>, vector<32x16xf32>
    %1 = arith.truncf %0 : vector<32x16xf32> to vector<32x16xbf16>
    %c0_1 = arith.constant 0 : index
    %c0_2 = arith.constant 0 : index
    %2 = vector.load %arg3[%c0_1, %c0_2] : memref<16x32xbf16, #tpu.memory_space<vmem>>, vector<16x32xbf16>
    %cst = arith.constant dense<0.000000e+00> : vector<32x32xf32>
    %3 = tpu.matmul %1, %2, %cst {dimension_numbers = #tpu.dot_dimension_numbers<[1], [0], [0], [1], [0, 0, 1, 1], [], []>} : vector<32x16xbf16>, vector<16x32xbf16>, vector<32x32xf32> -> vector<32x32xf32>
    %c0_3 = arith.constant 0 : index
    %c0_4 = arith.constant 0 : index
    %4 = vector.load %arg4[%c0_3, %c0_4] : memref<1x32xf32, #tpu.memory_space<vmem>>, vector<1x32xf32>
    %5 = vector.broadcast %4 : vector<1x32xf32> to vector<32x32xf32>
    %6 = arith.addf %3, %5 : vector<32x32xf32>
    %cst_5 = arith.constant 0.000000e+00 : f32
    %7 = vector.broadcast %cst_5 : f32 to vector<32x32xf32>
    %8 = arith.maximumf %6, %7 : vector<32x32xf32>
    %9 = arith.truncf %8 : vector<32x32xf32> to vector<32x32xbf16>
    %c0_6 = arith.constant 0 : index
    %c0_7 = arith.constant 0 : index
    %10 = vector.load %arg5[%c0_6, %c0_7] : memref<32x32xbf16, #tpu.memory_space<vmem>>, vector<32x32xbf16>
    %cst_8 = arith.constant dense<0.000000e+00> : vector<32x32xf32>
    %11 = tpu.matmul %9, %10, %cst_8 {dimension_numbers = #tpu.dot_dimension_numbers<[1], [0], [0], [1], [0, 0, 1, 1], [], []>} : vector<32x32xbf16>, vector<32x32xbf16>, vector<32x32xf32> -> vector<32x32xf32>
    %c0_9 = arith.constant 0 : index
    %c0_10 = arith.constant 0 : index
    %12 = vector.load %arg6[%c0_9, %c0_10] : memref<1x32xf32, #tpu.memory_space<vmem>>, vector<1x32xf32>
    %13 = vector.broadcast %12 : vector<1x32xf32> to vector<32x32xf32>
    %14 = arith.addf %11, %13 : vector<32x32xf32>
    %cst_11 = arith.constant 0.000000e+00 : f32
    %15 = vector.broadcast %cst_11 : f32 to vector<32x32xf32>
    %16 = arith.maximumf %14, %15 : vector<32x32xf32>
    %17 = arith.truncf %16 : vector<32x32xf32> to vector<32x32xbf16>
    %c0_12 = arith.constant 0 : index
    %c0_13 = arith.constant 0 : index
    %18 = vector.load %arg7[%c0_12, %c0_13] : memref<32x16xbf16, #tpu.memory_space<vmem>>, vector<32x16xbf16>
    %cst_14 = arith.constant dense<0.000000e+00> : vector<32x16xf32>
    %19 = tpu.matmul %17, %18, %cst_14 {dimension_numbers = #tpu.dot_dimension_numbers<[1], [0], [0], [1], [0, 0, 1, 1], [], []>} : vector<32x32xbf16>, vector<32x16xbf16>, vector<32x16xf32> -> vector<32x16xf32>
    %c0_15 = arith.constant 0 : index
    %c0_16 = arith.constant 0 : index
    %20 = vector.load %arg8[%c0_15, %c0_16] : memref<1x16xf32, #tpu.memory_space<vmem>>, vector<1x16xf32>
    %21 = vector.broadcast %20 : vector<1x16xf32> to vector<32x16xf32>
    %22 = arith.addf %19, %21 : vector<32x16xf32>
    %23 = vector.extract_strided_slice %22 {offsets = [0, 0], sizes = [32, 8], strides = [1, 1]} : vector<32x16xf32> to vector<32x8xf32>
    %24 = vector.extract_strided_slice %22 {offsets = [0, 8], sizes = [32, 8], strides = [1, 1]} : vector<32x16xf32> to vector<32x8xf32>
    %cst_17 = arith.constant 5.000000e-01 : f32
    %25 = vector.broadcast %cst_17 : f32 to vector<32x8xf32>
    %26 = arith.mulf %25, %24 : vector<32x8xf32>
    %27 = math.exp %26 : vector<32x8xf32>
    %c0_18 = arith.constant 0 : index
    %c0_19 = arith.constant 0 : index
    %28 = vector.load %arg2[%c0_18, %c0_19] : memref<32x8xf32, #tpu.memory_space<vmem>>, vector<32x8xf32>
    %29 = arith.mulf %28, %27 : vector<32x8xf32>
    %30 = arith.addf %23, %29 : vector<32x8xf32>
    %31 = arith.truncf %30 : vector<32x8xf32> to vector<32x8xbf16>
    %c0_20 = arith.constant 0 : index
    %c0_21 = arith.constant 0 : index
    %32 = vector.load %arg9[%c0_20, %c0_21] : memref<8x32xbf16, #tpu.memory_space<vmem>>, vector<8x32xbf16>
    %cst_22 = arith.constant dense<0.000000e+00> : vector<32x32xf32>
    %33 = tpu.matmul %31, %32, %cst_22 {dimension_numbers = #tpu.dot_dimension_numbers<[1], [0], [0], [1], [0, 0, 1, 1], [], []>} : vector<32x8xbf16>, vector<8x32xbf16>, vector<32x32xf32> -> vector<32x32xf32>
    %c0_23 = arith.constant 0 : index
    %c0_24 = arith.constant 0 : index
    %34 = vector.load %arg10[%c0_23, %c0_24] : memref<1x32xf32, #tpu.memory_space<vmem>>, vector<1x32xf32>
    %35 = vector.broadcast %34 : vector<1x32xf32> to vector<32x32xf32>
    %36 = arith.addf %33, %35 : vector<32x32xf32>
    %cst_25 = arith.constant 0.000000e+00 : f32
    %37 = vector.broadcast %cst_25 : f32 to vector<32x32xf32>
    %38 = arith.maximumf %36, %37 : vector<32x32xf32>
    %39 = arith.truncf %38 : vector<32x32xf32> to vector<32x32xbf16>
    %c0_26 = arith.constant 0 : index
    %c0_27 = arith.constant 0 : index
    %40 = vector.load %arg11[%c0_26, %c0_27] : memref<32x32xbf16, #tpu.memory_space<vmem>>, vector<32x32xbf16>
    %cst_28 = arith.constant dense<0.000000e+00> : vector<32x32xf32>
    %41 = tpu.matmul %39, %40, %cst_28 {dimension_numbers = #tpu.dot_dimension_numbers<[1], [0], [0], [1], [0, 0, 1, 1], [], []>} : vector<32x32xbf16>, vector<32x32xbf16>, vector<32x32xf32> -> vector<32x32xf32>
    %c0_29 = arith.constant 0 : index
    %c0_30 = arith.constant 0 : index
    %42 = vector.load %arg12[%c0_29, %c0_30] : memref<1x32xf32, #tpu.memory_space<vmem>>, vector<1x32xf32>
    %43 = vector.broadcast %42 : vector<1x32xf32> to vector<32x32xf32>
    %44 = arith.addf %41, %43 : vector<32x32xf32>
    %cst_31 = arith.constant 0.000000e+00 : f32
    %45 = vector.broadcast %cst_31 : f32 to vector<32x32xf32>
    %46 = arith.maximumf %44, %45 : vector<32x32xf32>
    %47 = arith.truncf %46 : vector<32x32xf32> to vector<32x32xbf16>
    %c0_32 = arith.constant 0 : index
    %c0_33 = arith.constant 0 : index
    %48 = vector.load %arg13[%c0_32, %c0_33] : memref<32x16xbf16, #tpu.memory_space<vmem>>, vector<32x16xbf16>
    %cst_34 = arith.constant dense<0.000000e+00> : vector<32x16xf32>
    %49 = tpu.matmul %47, %48, %cst_34 {dimension_numbers = #tpu.dot_dimension_numbers<[1], [0], [0], [1], [0, 0, 1, 1], [], []>} : vector<32x32xbf16>, vector<32x16xbf16>, vector<32x16xf32> -> vector<32x16xf32>
    %c0_35 = arith.constant 0 : index
    %c0_36 = arith.constant 0 : index
    %50 = vector.load %arg14[%c0_35, %c0_36] : memref<1x16xf32, #tpu.memory_space<vmem>>, vector<1x16xf32>
    %51 = vector.broadcast %50 : vector<1x16xf32> to vector<32x16xf32>
    %52 = arith.addf %49, %51 : vector<32x16xf32>
    %53 = tpu.concatenate %52, %23, %24 in 1 : vector<32x16xf32>, vector<32x8xf32>, vector<32x8xf32> -> vector<32x32xf32>
    %c0_37 = arith.constant 0 : index
    %c0_38 = arith.constant 0 : index
    %54 = vector.load %arg15[%c0_37, %c0_38] : memref<32x32xf32, #tpu.memory_space<vmem>>, vector<32x32xf32>
    tpu.vector_store %arg15[%c0_37, %c0_38], %53 {strides = array<i32>} : memref<32x32xf32, #tpu.memory_space<vmem>>, vector<32x32xf32>,
    return
  }
  func.func @transform_0(%arg0: i32) -> (i32, i32) {
    %c0_i32 = arith.constant 0 : i32
    %c0_i32_0 = arith.constant 0 : i32
    return %arg0, %c0_i32 : i32, i32
  }
  func.func @transform_1(%arg0: i32) -> (i32, i32) {
    %c0_i32 = arith.constant 0 : i32
    %c0_i32_0 = arith.constant 0 : i32
    return %arg0, %c0_i32 : i32, i32
  }
  func.func @transform_2(%arg0: i32) -> (i32, i32) {
    %c0_i32 = arith.constant 0 : i32
    %c0_i32_0 = arith.constant 0 : i32
    %c0_i32_1 = arith.constant 0 : i32
    return %c0_i32, %c0_i32_0 : i32, i32
  }
  func.func @transform_3(%arg0: i32) -> (i32, i32) {
    %c0_i32 = arith.constant 0 : i32
    %c0_i32_0 = arith.constant 0 : i32
    %c0_i32_1 = arith.constant 0 : i32
    return %c0_i32, %c0_i32_0 : i32, i32
  }
  func.func @transform_4(%arg0: i32) -> (i32, i32) {
    %c0_i32 = arith.constant 0 : i32
    %c0_i32_0 = arith.constant 0 : i32
    %c0_i32_1 = arith.constant 0 : i32
    return %c0_i32, %c0_i32_0 : i32, i32
  }
  func.func @transform_5(%arg0: i32) -> (i32, i32) {
    %c0_i32 = arith.constant 0 : i32
    %c0_i32_0 = arith.constant 0 : i32
    %c0_i32_1 = arith.constant 0 : i32
    return %c0_i32, %c0_i32_0 : i32, i32
  }
  func.func @transform_6(%arg0: i32) -> (i32, i32) {
    %c0_i32 = arith.constant 0 : i32
    %c0_i32_0 = arith.constant 0 : i32
    %c0_i32_1 = arith.constant 0 : i32
    return %c0_i32, %c0_i32_0 : i32, i32
  }
  func.func @transform_7(%arg0: i32) -> (i32, i32) {
    %c0_i32 = arith.constant 0 : i32
    %c0_i32_0 = arith.constant 0 : i32
    %c0_i32_1 = arith.constant 0 : i32
    return %c0_i32, %c0_i32_0 : i32, i32
  }
  func.func @transform_8(%arg0: i32) -> (i32, i32) {
    %c0_i32 = arith.constant 0 : i32
    %c0_i32_0 = arith.constant 0 : i32
    %c0_i32_1 = arith.constant 0 : i32
    return %c0_i32, %c0_i32_0 : i32, i32
  }
  func.func @transform_9(%arg0: i32) -> (i32, i32) {
    %c0_i32 = arith.constant 0 : i32
    %c0_i32_0 = arith.constant 0 : i32
    %c0_i32_1 = arith.constant 0 : i32
    return %c0_i32, %c0_i32_0 : i32, i32
  }
  func.func @transform_10(%arg0: i32) -> (i32, i32) {
    %c0_i32 = arith.constant 0 : i32
    %c0_i32_0 = arith.constant 0 : i32
    %c0_i32_1 = arith.constant 0 : i32
    return %c0_i32, %c0_i32_0 : i32, i32
  }
  func.func @transform_11(%arg0: i32) -> (i32, i32) {
    %c0_i32 = arith.constant 0 : i32
    %c0_i32_0 = arith.constant 0 : i32
    %c0_i32_1 = arith.constant 0 : i32
    return %c0_i32, %c0_i32_0 : i32, i32
  }
  func.func @transform_12(%arg0: i32) -> (i32, i32) {
    %c0_i32 = arith.constant 0 : i32
    %c0_i32_0 = arith.constant 0 : i32
    %c0_i32_1 = arith.constant 0 : i32
    return %c0_i32, %c0_i32_0 : i32, i32
  }
  func.func @transform_13(%arg0: i32) -> (i32, i32) {
    %c0_i32 = arith.constant 0 : i32
    %c0_i32_0 = arith.constant 0 : i32
    %c0_i32_1 = arith.constant 0 : i32
    return %c0_i32, %c0_i32_0 : i32, i32
  }
  func.func @transform_14(%arg0: i32) -> (i32, i32) {
    %c0_i32 = arith.constant 0 : i32
    %c0_i32_0 = arith.constant 0 : i32
    return %arg0, %c0_i32 : i32, i32
  }
}

</mosaic_0001>

<bundles_post_ra>
// kernel: tpu_custom_call.1
= control target key start
LH: loop header
LB: loop body
LE: loop exit
PB: predicated region body
PF: predicated region fallthrough
CT: control target
= control target key end

     0   :  { %s1334_s29 = smov 0   ;;  %s1429_s0 = inlined_call_operand.vmem [shape: f32[64,16], index: 0, kind: input, shape index: {}]   ;;  %s1430_s1 = inlined_call_operand.vmem [shape: f32[64,8], index: 1, kind: input, shape index: {}]   ;;  %s1431_s2 = inlined_call_operand.vmem [shape: bf16[16,32], index: 2, kind: input, shape index: {}]   ;;  %s1432_s3 = inlined_call_operand.vmem [shape: f32[1,32], index: 3, kind: input, shape index: {}]   ;;  %s1433_s4 = inlined_call_operand.vmem [shape: bf16[32,32], index: 4, kind: input, shape index: {}]   ;;  %s1434_s5 = inlined_call_operand.vmem [shape: f32[1,32], index: 5, kind: input, shape index: {}]   ;;  %s1435_s6 = inlined_call_operand.vmem [shape: bf16[32,16], index: 6, kind: input, shape index: {}]   ;;  %s1436_s7 = inlined_call_operand.vmem [shape: f32[1,16], index: 7, kind: input, shape index: {}]   ;;  %s1437_s8 = inlined_call_operand.vmem [shape: bf16[8,32], index: 8, kind: input, shape index: {}]   ;;  %s1438_s9 = inlined_call_operand.vmem [shape: f32[1,32], index: 9, kind: input, shape index: {}]   ;;  %s1439_s10 = inlined_call_operand.vmem [shape: bf16[32,32], index: 10, kind: input, shape index: {}]   ;;  %s1440_s11 = inlined_call_operand.vmem [shape: f32[1,32], index: 11, kind: input, shape index: {}]   ;;  %s1441_s12 = inlined_call_operand.vmem [shape: bf16[32,16], index: 12, kind: input, shape index: {}]   ;;  %s1442_s13 = inlined_call_operand.vmem [shape: f32[1,16], index: 13, kind: input, shape index: {}]   ;;  %s1443_s14 = inlined_call_operand.vmem [shape: f32[64,32], index: 14, kind: output, shape index: {}]  }
   0x1 LB: > { %s1115_s30 = sadd.s32 4294967295, %s1255_s29   ;;  %p1119_p0 = scmp.ge.s32.totalorder %s1255_s29, 1  ;;  %s1255_s29 = sphi %s1334_s29, %s24_s29  }
   0x2   : > { %p424_p1 = scmp.lt.s32.totalorder %s1255_s29, 3 }
   0x4   : > { %p425_p2 = pnand %p1119_p0, %p424_p1 }
   0x5   : > { %v1232_v0 = vld [vmem:[%s1431_s2] sm:$0xff] (!%p425_p2)   ;;  %s1120_s17 = sshll.u32 (!%p425_p2), %s1115_s30, 2  ;;  %vm515_vm0 = vcmask (!%p425_p2), 130048   ;;  %v1234_v8 = vld [vmem:[%s1433_s4 + $0x8] sm:$0xff] (!%p425_p2)   ;;  %vm600_vm1 = vcmask (!%p425_p2), 261120   ;;  %vm797_vm2 = vcmask (!%p425_p2), 1043456  }
   0x6   : > { %428 = sbr.rel (%p425_p2) target bundleno = 1484 (0x5cc), region = 76  ;;  %p476_p3 = scmp.lt.s32.totalorder (!%p425_p2), %s1120_s17, 7  ;;  %1177 = vmatprep.subr.bf16.mxu0 (!%p425_p2), %v1232_v0  ;;  %v1233_v7 = vld [vmem:[%s1433_s4] sm:$0xff] (!%p425_p2)   ;;  %v1236_v25 = vld [vmem:[%s1435_s6 + $0x8] sm:$0xff] (!%p425_p2)   ;;  %vm790_vm3 = vcmask (!%p425_p2), 64512   ;;  %vm1038_vm4 = vcmask (!%p425_p2), 195584  }
   0x7   : > { %1178 = vmatpush3.bf16.msra.mxu0 (!%p425_p2), %v1232_v0  ;;  %1183 = vmatprep.subr.bf16.mxu1 (!%p425_p2), %v1233_v7  ;;  %v1126_v9 = vld [vmem:[%s1432_s3] ss:$0 sm:$0xff] (!%p425_p2)  ;;  %s1257_s24 = smov (!%p425_p2), 120   ;;  %s1258_s25 = smov (!%p425_p2), 16  }
   0x8   : > { %1184 = vmatpush3.bf16.msra.mxu1 (!%p425_p2), %v1233_v7  ;;  %v1235_v24 = vld [vmem:[%s1435_s6] sm:$0xff] (!%p425_p2)  }
   0x9   : > { %1185 = vmatprep.subr.bf16.mxu1 (!%p425_p2), %v1234_v8  ;;  %1191 = vmatprep.subr.bf16.mxu0 (!%p425_p2), %v1235_v24  ;;  %v1130_v26 = vld [vmem:[%s1434_s5] ss:$0 sm:$0xff] (!%p425_p2) }
   0xa   : > { %v1135_v41 = vld [vmem:[%s1436_s7] ss:$0 sm:$0xff] (!%p425_p2) }
   0xb   : > { %v782_v58 = vld [vmem:[%s1437_s8] sm:$0xf] (!%p425_p2) }
   0xc   : > { %1186 = vmatpush3.bf16.msra.mxu1 (!%p425_p2), %v1234_v8  ;;  %v799_v59 = vsel (!%p425_p2), %vm797_vm2, %v782_v58, 0 }
   0xd   : > { %s1445_s17 = smov (!%p476_p3, %s1120_s17), 7  ;;  %1221 = vmatprep.subr.msk.bf16.mxu1 %vm797_vm2, %v782_v58 }
   0xe   : > { %s1345_s18 = sshll.u32 %s1445_s17, 3 }
   0xf   : > { %s479_s21 = scalar_lea.vmem %s1429_s0, %s1345_s18  ;;  %s485_s28 = scalar_lea.vmem %s1430_s1, %s1345_s18 }
  0x10   : > { %v494_v1 = vld [vmem:[%s479_s21] sm:$0xff]  ;;  %v495_v2 = vld [vmem:[%s479_s21 + $0x8] sm:$0xff]  ;;  %v496_v3 = vld [vmem:[%s479_s21 + $0x10] sm:$0xff]  ;;  %s491_s16 = scalar_lea.vmem %s1443_s14, %s1345_s18 }
  0x11   : > { %v498_v4 = vpack.c.bf16 %v495_v2, %v494_v1  ;;  %v497_v5 = vld [vmem:[%s479_s21 + $0x18] sm:$0xff]  ;;  %v752_v1 = vld [vmem:[%s485_s28] sm:$0xff] }
  0x12   : > { %v499_v6 = vpack.c.bf16 %v497_v5, %v496_v3  ;;  %v754_v3 = vld [vmem:[%s485_s28 + $0x10] sm:$0xff]  ;;  %v753_v5 = vld [vmem:[%s485_s28 + $0x8] sm:$0xff] }
  0x13   : > { %1179 = vmatprep.mubr.msk.bf16.mxu0 %vm515_vm0, %v498_v4  ;;  %v755_v4 = vld [vmem:[%s485_s28 + $0x18] sm:$0xff] }
  0x14   : > { %1180 = vmatmul.mubr.msk.bf16.vlgmr.msra.gmra.mrb[0].mxu0 %vm515_vm0, %v499_v6 }
  0x15   : > { %1192 = vmatpush3.bf16.msra.mxu0 %v1235_v24 }
  0x16   : > { %1193 = vmatprep.subr.bf16.mxu0 %v1236_v25 }
  0x19   : > { %1194 = vmatpush3.bf16.msra.mxu0 %v1236_v25 }
  0xe7   : > { %v1181_v10 = vpop.f32.mrb[0].mxu0 }
  0xe8   : > { %v565_v11 = vadd.f32 %v1181_v10, %v1126_v9  ;;  %v556_v12 = vpop.f32.mrb[1].mxu0 }
  0xe9   : > { %v557_v13 = vadd.f32 %v1126_v9, %v556_v12  ;;  %v1182_v14 = vpop.f32.mrb[2].mxu0 }
  0xea   : > { %v568_v15 = vadd.f32 %v1182_v14, %v1126_v9  ;;  %v559_v16 = vpop.f32.mrb[3].mxu0  ;;  %v573_v18 = vmax.f32 %v565_v11, 0.0 }
  0xeb   : > { %v560_v17 = vadd.f32 %v1126_v9, %v559_v16  ;;  %v571_v20 = vmax.f32 %v557_v13, 0.0 }
  0xec   : > { %v574_v19 = vmax.f32 %v568_v15, 0.0 }
  0xed   : > { %v572_v21 = vmax.f32 %v560_v17, 0.0 }
  0xee   : > { %v576_v22 = vpack.c.bf16 %v574_v19, %v573_v18  ;;  %v1237_v18 = vld [vmem:[%s1439_s10] sm:$0xff]   ;;  %v1238_v19 = vld [vmem:[%s1439_s10 + $0x8] sm:$0xff]  }
  0xef   : > { %v575_v23 = vpack.c.bf16 %v572_v21, %v571_v20  ;;  %1205 = vmatprep.subr.bf16.mxu0 %v1237_v18  ;;  %v1140_v20 = vld [vmem:[%s1438_s9] ss:$0 sm:$0xff] }
  0xf1   : > { %1187 = vmatprep.mubr.msk.bf16.mxu1 %vm600_vm1, %v575_v23 }
  0xf2   : > { %1188 = vmatmul.mubr.msk.bf16.vlgmr.msra.gmra.mrb[0].mxu1 %vm600_vm1, %v576_v22 }
  0xf3   : > { %1200 = vmatpush3.bf16.msra.mxu1 %v799_v59 }
 0x1c5   : > { %v1189_v27 = vpop.f32.mrb[0].mxu1 }
 0x1c6   : > { %v650_v28 = vadd.f32 %v1189_v27, %v1130_v26  ;;  %v641_v29 = vpop.f32.mrb[1].mxu1 }
 0x1c7   : > { %v642_v30 = vadd.f32 %v1130_v26, %v641_v29  ;;  %v1190_v31 = vpop.f32.mrb[2].mxu1 }
 0x1c8   : > { %v653_v32 = vadd.f32 %v1190_v31, %v1130_v26  ;;  %v644_v33 = vpop.f32.mrb[3].mxu1  ;;  %v658_v35 = vmax.f32 %v650_v28, 0.0 }
 0x1c9   : > { %v645_v34 = vadd.f32 %v1130_v26, %v644_v33  ;;  %v656_v37 = vmax.f32 %v642_v30, 0.0 }
 0x1ca   : > { %v659_v36 = vmax.f32 %v653_v32, 0.0 }
 0x1cb   : > { %v657_v38 = vmax.f32 %v645_v34, 0.0 }
 0x1cc   : > { %v661_v39 = vpack.c.bf16 %v659_v36, %v658_v35  ;;  %v1239_v35 = vld [vmem:[%s1441_s12] sm:$0xff]   ;;  %v1240_v36 = vld [vmem:[%s1441_s12 + $0x8] sm:$0xff]  }
 0x1cd   : > { %v660_v40 = vpack.c.bf16 %v657_v38, %v656_v37  ;;  %1213 = vmatprep.subr.bf16.mxu1 %v1239_v35  ;;  %v1143_v37 = vld [vmem:[%s1440_s11] ss:$0 sm:$0xff] }
 0x1cf   : > { %1195 = vmatprep.mubr.msk.bf16.mxu0 %vm600_vm1, %v660_v40 }
 0x1d0   : > { %1196 = vmatmul.mubr.msk.bf16.vlgmr.msra.gmra.mrb[4].mxu0 %vm600_vm1, %v661_v39 }
 0x1d1   : > { %1206 = vmatpush3.bf16.msra.mxu0 %v1237_v18 }
 0x1d2   : > { %1207 = vmatprep.subr.bf16.mxu0 %v1238_v19 }
 0x1d5   : > { %1208 = vmatpush3.bf16.msra.mxu0 %v1238_v19 }
 0x2a3   : > { %v1197_v42 = vpop.f32.mrb[4].mxu0 }
 0x2a4   : > { %v734_v43 = vadd.f32 %v1197_v42, %v1135_v41  ;;  %v725_v44 = vpop.f32.mrb[5].mxu0 }
 0x2a5   : > { %v726_v45 = vadd.f32 %v1135_v41, %v725_v44  ;;  %v1198_v46 = vpop.f32.mrb[6].mxu0 }
 0x2a6   : > { %v742_v47 = vmul.f32 0.5, %v734_v43  ;;  %v737_v48 = vadd.f32 %v1198_v46, %v1135_v41  ;;  %v728_v49 = vpop.f32.mrb[7].mxu0 }
 0x2a7   : > { %v740_v50 = vmul.f32 0.5, %v726_v45  ;;  %v729_v51 = vadd.f32 %v1135_v41, %v728_v49 }
 0x2a8   : > { %v748_v52 = vmul.f32 1.442695, %v742_v47  ;;  %v743_v53 = vmul.f32 0.5, %v737_v48 }
 0x2a9   : > { %v744_v54 = vmul.f32 1.442695, %v740_v50  ;;  %v741_v55 = vmul.f32 0.5, %v729_v51 }
 0x2aa   : > { %1241 = vpow2.f32 %v748_v52  ;;  %v750_v56 = vmul.f32 1.442695, %v743_v53  ;;  %v1148_v53 = vld [vmem:[%s1442_s13] ss:$0 sm:$0xff] }
 0x2ab   : > { %1243 = vpow2.f32 %v744_v54  ;;  %v746_v57 = vmul.f32 1.442695, %v741_v55 }
 0x2ac   : > { %1245 = vpow2.f32 %v750_v56 }
 0x2ad   : > { %1247 = vpow2.f32 %v746_v57 }
 0x2b4   : > { %v1242_v60 = vpop.eup %1241 }
 0x2b5   : > { %v1244_v61 = vpop.eup %1243  ;;  %764 = vrot.lane.b32.xlu1 %v1242_v60, %s1257_s24 }
 0x2b6   : > { %760 = vrot.lane.b32.xlu0 %v1244_v61, %s1257_s24  ;;  %v1246_v62 = vpop.eup %1245 }
 0x2b7   : > { %v1248_v63 = vpop.eup %1247 }
 0x2b9   : > { %766 = vrot.lane.b32.xlu1 %v1246_v62, %s1257_s24 }
 0x2ba   : > { %762 = vrot.lane.b32.xlu0 %v1248_v63, %s1257_s24 }
 0x2bd   : > { %1024 = vrot.lane.b32.xlu1 %v729_v51, %s1258_s25 }
 0x2be   : > { %1022 = vrot.lane.b32.xlu0 %v726_v45, %s1258_s25 }
 0x2c1   : > { %1028 = vrot.lane.b32.xlu1 %v737_v48, %s1258_s25 }
 0x2c2   : > { %1026 = vrot.lane.b32.xlu0 %v734_v43, %s1258_s25 }
 0x327   : > { %v765_v0 = vpop.permute.xlu1 %764 }
 0x328   : > { %v761_v2 = vpop.permute.xlu0 %760  ;;  %v774_v8 = vmul.f32 %v765_v0, %v754_v3 }
 0x329   : > { %v772_v6 = vmul.f32 %v761_v2, %v752_v1 }
 0x32a   : > { %v778_v15 = vadd.f32 %v774_v8, %v734_v43 }
 0x32b   : > { %v767_v7 = vpop.permute.xlu1 %766  ;;  %v776_v13 = vadd.f32 %v772_v6, %v726_v45 }
 0x32c   : > { %v775_v9 = vmul.f32 %v767_v7, %v755_v4  ;;  %v763_v10 = vpop.permute.xlu0 %762 }
 0x32d   : > { %v773_v11 = vmul.f32 %v763_v10, %v753_v5 }
 0x32e   : > { %v779_v12 = vadd.f32 %v775_v9, %v737_v48 }
 0x32f   : > { %v777_v14 = vadd.f32 %v773_v11, %v729_v51  ;;  %v1025_v54 = vpop.permute.xlu1 %1024 }
 0x330   : > { %v781_v17 = vpack.c.bf16 %v779_v12, %v778_v15  ;;  %v1023_v52 = vpop.permute.xlu0 %1022 }
 0x331   : > { %v780_v16 = vpack.c.bf16 %v777_v14, %v776_v13 }
 0x333   : > { %1201 = vmatprep.mubr.msk.bf16.mxu1 %vm790_vm3, %v780_v16  ;;  %v1029_v1 = vpop.permute.xlu1 %1028 }
 0x334   : > { %1202 = vmatmul.mubr.msk.bf16.vlgmr.msra.gmra.mrb[4].mxu1 %vm790_vm3, %v781_v17  ;;  %v1027_v62 = vpop.permute.xlu0 %1026 }
 0x335   : > { %1214 = vmatpush3.bf16.msra.mxu1 %v1239_v35 }
 0x336   : > { %1215 = vmatprep.subr.bf16.mxu1 %v1240_v36 }
 0x339   : > { %1216 = vmatpush3.bf16.msra.mxu1 %v1240_v36 }
 0x407   : > { %v1203_v21 = vpop.f32.mrb[4].mxu1 }
 0x408   : > { %v844_v22 = vadd.f32 %v1203_v21, %v1140_v20  ;;  %v835_v23 = vpop.f32.mrb[5].mxu1 }
 0x409   : > { %v836_v24 = vadd.f32 %v1140_v20, %v835_v23  ;;  %v1204_v25 = vpop.f32.mrb[6].mxu1 }
 0x40a   : > { %v847_v26 = vadd.f32 %v1204_v25, %v1140_v20  ;;  %v838_v27 = vpop.f32.mrb[7].mxu1  ;;  %v852_v29 = vmax.f32 %v844_v22, 0.0 }
 0x40b   : > { %v839_v28 = vadd.f32 %v1140_v20, %v838_v27  ;;  %v850_v31 = vmax.f32 %v836_v24, 0.0 }
 0x40c   : > { %v853_v30 = vmax.f32 %v847_v26, 0.0 }
 0x40d   : > { %v851_v32 = vmax.f32 %v839_v28, 0.0 }
 0x40e   : > { %v855_v33 = vpack.c.bf16 %v853_v30, %v852_v29 }
 0x40f   : > { %v854_v34 = vpack.c.bf16 %v851_v32, %v850_v31 }
 0x411   : > { %1209 = vmatprep.mubr.msk.bf16.mxu0 %vm600_vm1, %v854_v34 }
 0x412   : > { %1210 = vmatmul.mubr.msk.bf16.vlgmr.msra.gmra.mrb[8].mxu0 %vm600_vm1, %v855_v33 }
 0x4e5   : > { %v1211_v38 = vpop.f32.mrb[8].mxu0 }
 0x4e6   : > { %v928_v39 = vadd.f32 %v1211_v38, %v1143_v37  ;;  %v919_v40 = vpop.f32.mrb[9].mxu0 }
 0x4e7   : > { %v920_v41 = vadd.f32 %v1143_v37, %v919_v40  ;;  %v1212_v42 = vpop.f32.mrb[10].mxu0 }
 0x4e8   : > { %v931_v43 = vadd.f32 %v1212_v42, %v1143_v37  ;;  %v922_v44 = vpop.f32.mrb[11].mxu0  ;;  %v936_v46 = vmax.f32 %v928_v39, 0.0 }
 0x4e9   : > { %v923_v45 = vadd.f32 %v1143_v37, %v922_v44  ;;  %v934_v48 = vmax.f32 %v920_v41, 0.0 }
 0x4ea   : > { %v937_v47 = vmax.f32 %v931_v43, 0.0 }
 0x4eb   : > { %v935_v49 = vmax.f32 %v923_v45, 0.0 }
 0x4ec   : > { %v939_v50 = vpack.c.bf16 %v937_v47, %v936_v46 }
 0x4ed   : > { %v938_v51 = vpack.c.bf16 %v935_v49, %v934_v48 }
 0x4ef   : > { %1217 = vmatprep.mubr.msk.bf16.mxu1 %vm600_vm1, %v938_v51 }
 0x4f0   : > { %1218 = vmatmul.mubr.msk.bf16.vlgmr.msra.gmra.mrb[8].mxu1 %vm600_vm1, %v939_v50 }
 0x5c3   : > { %v1219_v55 = vpop.f32.mrb[8].mxu1 }
 0x5c4   : > { %v1012_v56 = vadd.f32 %v1219_v55, %v1148_v53  ;;  %v1003_v57 = vpop.f32.mrb[9].mxu1 }
 0x5c5   : > { %v1004_v58 = vadd.f32 %v1148_v53, %v1003_v57  ;;  %v1220_v59 = vpop.f32.mrb[10].mxu1 }
 0x5c6   : > { %v1015_v60 = vadd.f32 %v1220_v59, %v1148_v53  ;;  %v1006_v61 = vpop.f32.mrb[11].mxu1  ;;  %v1036_v2 = vsel %vm515_vm0, %v1012_v56, %v1027_v62 }
 0x5c7   : > { %v1034_v63 = vsel %vm515_vm0, %v1004_v58, %v1023_v52  ;;  %v1007_v0 = vadd.f32 %v1148_v53, %v1006_v61  ;;  %v1041_v7 = vsel %vm1038_vm4, %v1036_v2, %v1027_v62 }
 0x5c8   : > { %v1039_v3 = vsel %vm1038_vm4, %v1034_v63, %v1023_v52  ;;  %v1037_v4 = vsel %vm515_vm0, %v1015_v60, %v1029_v1  ;;  %1045 = vst.msk [vmem:[%s491_s16 + $0x10] sm:$0xff] %vm600_vm1, %v1041_v7 }
 0x5c9   : > { %1043 = vst.msk [vmem:[%s491_s16] sm:$0xff] %vm600_vm1, %v1039_v3  ;;  %v1035_v5 = vsel %vm515_vm0, %v1007_v0, %v1025_v54  ;;  %v1042_v8 = vsel %vm1038_vm4, %v1037_v4, %v1029_v1 }
 0x5ca   : > { %v1040_v6 = vsel %vm1038_vm4, %v1035_v5, %v1025_v54  ;;  %1046 = vst.msk [vmem:[%s491_s16 + $0x18] sm:$0xff] %vm600_vm1, %v1042_v8 }
 0x5cb   : > { %1044 = vst.msk [vmem:[%s491_s16 + $0x8] sm:$0xff] %vm600_vm1, %v1040_v6 }
 0x5cc PF: > { %s24_s29 = sadd.s32 1, %s1255_s29  }
 0x5cd   : > { %p21_p4 = scmp.ge.s32.totalorder %s24_s29, 4  }
 0x5cf   :  { %23 = sbr.rel (!%p21_p4) target bundleno = 1 (0x1), region = 109 }

</bundles_post_ra>
